<compile_context>
chip_gen: v6e
topology: v6e:2x2x1
jax: 0.10.0
libtpu: 0.0.40
codegen_flags: <defaults>
</compile_context>

<pallas_src>
import functools

import jax
import jax.numpy as jnp
from jax import lax
from jax.experimental import pallas as pl
from jax.experimental.pallas import tpu as pltpu


def _infonce_stats_kernel(zy_ref, zx_ref, stat_ref, m_sc, l_sc, d_sc, *,
                          tn, zx_resident, valid_b, mask_cols):
    # zy_ref : (tm, D)           rows of dataZY for this row-tile
    # zx_ref : (tn, D) or (Bp,D) rows of dataZX (column tile, or fully resident)
    # stat_ref : (tm, 1)         per-row  diag(scores) - logsumexp(scores)
    # m_sc / l_sc / d_sc : (tm, 1) running max / sum-exp / diagonal scratch
    i = pl.program_id(0)
    j = pl.program_id(1)

    @pl.when(j == 0)
    def _():
        m_sc[...] = jnp.full_like(m_sc, -jnp.inf)
        l_sc[...] = jnp.zeros_like(l_sc)
        d_sc[...] = jnp.zeros_like(d_sc)

    if zx_resident:
        col0 = pl.multiple_of(j * tn, tn)
        zx = zx_ref[pl.ds(col0, tn), :]
    else:
        zx = zx_ref[...]

    # (tm, D) @ (tn, D)^T on the MXU, f32 accumulation, DEFAULT precision.
    s = lax.dot_general(
        zy_ref[...], zx,
        dimension_numbers=(((1,), (1,)), ((), ())),
        preferred_element_type=jnp.float32,
    )
    tm = s.shape[0]

    # With tm == tn the diagonal only lives in the i == j tile: skip the
    # iota / compare / select / cross-lane reduce everywhere else.
    @pl.when(i == j)
    def _():
        row_ids = lax.broadcasted_iota(jnp.int32, (tm, tn), 0)
        col_ids = lax.broadcasted_iota(jnp.int32, (tm, tn), 1)
        d_sc[...] = jnp.sum(jnp.where(row_ids == col_ids, s, 0.0),
                            axis=1, keepdims=True)

    if mask_cols:
        # Padded columns (>= valid_b) must not contribute to the logsumexp.
        col_ids = j * tn + lax.broadcasted_iota(jnp.int32, (tm, tn), 1)
        s = jnp.where(col_ids < valid_b, s, -jnp.inf)

    # Online (numerically stable) logsumexp over the column-tile axis.
    m_new = jnp.maximum(m_sc[...], jnp.max(s, axis=1, keepdims=True))
    l_sc[...] = (l_sc[...] * jnp.exp(m_sc[...] - m_new)
                 + jnp.sum(jnp.exp(s - m_new), axis=1, keepdims=True))
    m_sc[...] = m_new

    @pl.when(j == pl.num_programs(1) - 1)
    def _():
        stat_ref[...] = d_sc[...] - (m_sc[...] + jnp.log(l_sc[...]))


def _pick_tile(bp, d, itemsize, zx_resident, vmem_budget=24 * 1024 * 1024):
    """Largest square score tile in {512, 256, 128} that divides bp, keeps at
    least 2 row tiles (megacore sharding) and fits a conservative VMEM
    estimate (sized with headroom for v7x's smaller scoped default)."""
    zx_fixed = 2 * bp * d * itemsize if zx_resident else 0
    for t in (512, 256, 128):
        if bp % t != 0:
            continue
        if bp // t < 2 and t != 128:
            continue
        zy_bytes = 2 * t * d * itemsize                 # double-buffered ZY tile
        zx_bytes = zx_fixed if zx_resident else 2 * t * d * itemsize
        work_bytes = 2 * t * t * 4                      # score tile + temporaries
        if zy_bytes + zx_bytes + work_bytes <= vmem_budget:
            return t
    return 128


def _infonce_row_stats(dataZY, dataZX, *, zx_resident_bytes=8 * 1024 * 1024):
    """Fused Pallas kernel: per-row (scores[i,i] - logsumexp_j scores[i,j])
    for scores = dataZY @ dataZX^T, without materializing scores in HBM."""
    B, D = dataZY.shape
    assert dataZX.shape == (B, D)

    # Pad the batch up to a multiple of 128 so tiles stay (8,128)-legal and
    # the pipeline keeps full-size blocks for ragged batch sizes.
    bp = ((B + 127) // 128) * 128
    if bp != B:
        pad = bp - B
        dataZY = jnp.pad(dataZY, ((0, pad), (0, 0)))
        dataZX = jnp.pad(dataZX, ((0, pad), (0, 0)))

    itemsize = jnp.dtype(dataZX.dtype).itemsize
    zx_resident = bp * D * itemsize <= zx_resident_bytes
    tm = tn = _pick_tile(bp, D, itemsize, zx_resident)

    grid = (bp // tm, bp // tn)

    kernel = functools.partial(
        _infonce_stats_kernel,
        tn=tn, zx_resident=zx_resident, valid_b=B, mask_cols=(bp != B))

    if zx_resident:
        # Constant block index -> ZX is DMA'd into VMEM exactly once.
        zx_spec = pl.BlockSpec((bp, D), lambda i, j: (0, 0))
    else:
        zx_spec = pl.BlockSpec((tn, D), lambda i, j: (j, 0))

    stat = pl.pallas_call(
        kernel,
        out_shape=jax.ShapeDtypeStruct((bp, 1), jnp.float32),
        grid=grid,
        in_specs=[
            pl.BlockSpec((tm, D), lambda i, j: (i, 0)),   # dataZY row tile
            zx_spec,                                       # dataZX
        ],
        out_specs=pl.BlockSpec((tm, 1), lambda i, j: (i, 0)),
        scratch_shapes=[
            pltpu.VMEM((tm, 1), jnp.float32),   # running max
            pltpu.VMEM((tm, 1), jnp.float32),   # running sum-exp
            pltpu.VMEM((tm, 1), jnp.float32),   # diagonal
        ],
        compiler_params=pltpu.CompilerParams(
            dimension_semantics=("parallel", "arbitrary")),
    )(dataZY, dataZX)

    return stat[:B, 0]


def decoder_info_forward(dataZX, dataZY, *, estimator="infonce", mode="sep",
                         batch_size=None, log_baseline=None):
    """Pallas forward of decoder_INFO: returns the MI estimate (a scalar)."""
    if log_baseline is not None:
        # TODO(synk): log_baseline correction of estimate_mutual_information not wired in.
        raise NotImplementedError("log_baseline not supported")
    if estimator != "infonce":
        # TODO(synk): only the InfoNCE estimator is implemented here.
        raise NotImplementedError("only the 'infonce' estimator is implemented")

    if mode in ("sep", "bi"):
        B = dataZX.shape[0]
        stat = _infonce_row_stats(dataZY, dataZX)
        return jnp.log(jnp.float32(B)) + jnp.mean(stat)
    elif mode == "concat":
        # Pure layout op (reshape + transpose) -> no Pallas kernel needed.
        scores = jnp.reshape(dataZX, (batch_size, batch_size)).T
        diag = jnp.diagonal(scores)
        lse = jax.nn.logsumexp(scores, axis=1)
        return jnp.log(jnp.float32(batch_size)) + jnp.mean(diag - lse)
    else:
        raise ValueError("Invalid mode. Choose 'sep', 'bi', or 'concat'.")


if __name__ == "__main__":
    key = jax.random.PRNGKey(0)
    k_x, k_y, k_x2, k_y2 = jax.random.split(key, 4)

    D = 32
    scale = 1.0 / jnp.sqrt(jnp.float32(D))   # embedding-style scaling

    # --- 128-aligned batch: big-tile / ZX-resident path ---
    B = 256
    dataZX = jax.random.normal(k_x, (B, D), jnp.float32) * scale
    dataZY = jax.random.normal(k_y, (B, D), jnp.float32) * scale

    stat = jax.block_until_ready(_infonce_row_stats(dataZY, dataZX))
    mi = jax.block_until_ready(decoder_info_forward(dataZX, dataZY))

    scores_ref = jnp.dot(dataZY, dataZX.T)
    stat_ref = jnp.diagonal(scores_ref) - jax.nn.logsumexp(scores_ref, axis=1)
    mi_ref = jnp.log(jnp.float32(B)) + jnp.mean(stat_ref)

    assert stat.shape == (B,), stat.shape
    assert jnp.allclose(stat, stat_ref, atol=2e-2, rtol=2e-2), \
        float(jnp.max(jnp.abs(stat - stat_ref)))
    assert jnp.allclose(mi, mi_ref, atol=1e-2, rtol=1e-2), \
        (float(mi), float(mi_ref))

    # --- non-128-aligned batch: pad + column-mask path ---
    B2 = 200
    dataZX2 = jax.random.normal(k_x2, (B2, D), jnp.float32) * scale
    dataZY2 = jax.random.normal(k_y2, (B2, D), jnp.float32) * scale

    mi2 = jax.block_until_ready(decoder_info_forward(dataZX2, dataZY2))
    scores_ref2 = jnp.dot(dataZY2, dataZX2.T)
    mi_ref2 = (jnp.log(jnp.float32(B2))
               + jnp.mean(jnp.diagonal(scores_ref2)
                          - jax.nn.logsumexp(scores_ref2, axis=1)))
    assert jnp.allclose(mi2, mi_ref2, atol=1e-2, rtol=1e-2), \
        (float(mi2), float(mi_ref2))

    print("KERNEL_OK")
</pallas_src>

<mosaic_0001>
module attributes {stable_mosaic.version = 11 : i64} {
  func.func @_infonce_stats_kernel(%arg0: i32, %arg1: i32, %arg2: memref<128x32xf32, #tpu.memory_space<vmem>>, %arg3: memref<256x32xf32, #tpu.memory_space<vmem>>, %arg4: memref<128x1xf32, #tpu.memory_space<vmem>>, %arg5: memref<128x1xf32, #tpu.memory_space<vmem>>, %arg6: memref<128x1xf32, #tpu.memory_space<vmem>>, %arg7: memref<128x1xf32, #tpu.memory_space<vmem>>) attributes {dimension_semantics = [#tpu.dimension_semantics<parallel>, #tpu.dimension_semantics<arbitrary>], iteration_bounds = array<i64: 2, 2>, scalar_prefetch = 0 : i64, scratch_operands = 3 : i64, tpu.core_type = #tpu.core_type<tc>, window_params = [{transform_indices = @transform_0, window_bounds = array<i64: 128, 32>}, {pipeline_mode = #tpu.pipeline_mode<synchronous>, transform_indices = @transform_1, window_bounds = array<i64: 256, 32>}, {transform_indices = @transform_2, window_bounds = array<i64: 128, 1>}]} {
    %c0_i32 = arith.constant 0 : i32
    %0 = arith.cmpi eq, %arg1, %c0_i32 : i32
    %1 = arith.extui %0 : i1 to i32
    %c0_i32_0 = arith.constant 0 : i32
    %2 = arith.cmpi ne, %1, %c0_i32_0 : i32
    scf.if %2 {
      %cst_17 = arith.constant 0xFF800000 : f32
      %32 = vector.broadcast %cst_17 : f32 to vector<128x1xf32>
      %c0_18 = arith.constant 0 : index
      %c0_19 = arith.constant 0 : index
      %33 = vector.load %arg5[%c0_18, %c0_19] : memref<128x1xf32, #tpu.memory_space<vmem>>, vector<128x1xf32>
      tpu.vector_store %arg5[%c0_18, %c0_19], %32 {strides = array<i32>} : memref<128x1xf32, #tpu.memory_space<vmem>>, vector<128x1xf32>,
      %cst_20 = arith.constant 0.000000e+00 : f32
      %34 = vector.broadcast %cst_20 : f32 to vector<128x1xf32>
      %c0_21 = arith.constant 0 : index
      %c0_22 = arith.constant 0 : index
      %35 = vector.load %arg6[%c0_21, %c0_22] : memref<128x1xf32, #tpu.memory_space<vmem>>, vector<128x1xf32>
      tpu.vector_store %arg6[%c0_21, %c0_22], %34 {strides = array<i32>} : memref<128x1xf32, #tpu.memory_space<vmem>>, vector<128x1xf32>,
      %cst_23 = arith.constant 0.000000e+00 : f32
      %36 = vector.broadcast %cst_23 : f32 to vector<128x1xf32>
      %c0_24 = arith.constant 0 : index
      %c0_25 = arith.constant 0 : index
      %37 = vector.load %arg7[%c0_24, %c0_25] : memref<128x1xf32, #tpu.memory_space<vmem>>, vector<128x1xf32>
      tpu.vector_store %arg7[%c0_24, %c0_25], %36 {strides = array<i32>} : memref<128x1xf32, #tpu.memory_space<vmem>>, vector<128x1xf32>,
    } else {
    }
    %c128_i32 = arith.constant 128 : i32
    %3 = arith.muli %arg1, %c128_i32 : i32
    %4 = tpu.assume_multiple %3, 128 : i32
    %5 = arith.index_cast %4 : i32 to index
    %c0 = arith.constant 0 : index
    %6 = vector.load %arg3[%5, %c0] : memref<256x32xf32, #tpu.memory_space<vmem>>, vector<128x32xf32>
    %c0_1 = arith.constant 0 : index
    %c0_2 = arith.constant 0 : index
    %7 = vector.load %arg2[%c0_1, %c0_2] : memref<128x32xf32, #tpu.memory_space<vmem>>, vector<128x32xf32>
    %cst = arith.constant dense<0.000000e+00> : vector<128x128xf32>
    %8 = tpu.matmul %7, %6, %cst {dimension_numbers = #tpu.dot_dimension_numbers<[1], [1], [0], [0], [0, 0, 1, 0], [], []>} : vector<128x32xf32>, vector<128x32xf32>, vector<128x128xf32> -> vector<128x128xf32>
    %9 = arith.cmpi eq, %arg0, %arg1 : i32
    %10 = arith.extui %9 : i1 to i32
    %c0_i32_3 = arith.constant 0 : i32
    %11 = arith.cmpi ne, %10, %c0_i32_3 : i32
    scf.if %11 {
      %32 = tpu.iota {dimensions = array<i32: 0>} : vector<128x128xi32>
      %33 = tpu.iota {dimensions = array<i32: 1>} : vector<128x128xi32>
      %34 = arith.cmpi eq, %32, %33 : vector<128x128xi32>
      %cst_17 = arith.constant 0.000000e+00 : f32
      %35 = vector.broadcast %cst_17 : f32 to vector<128x128xf32>
      %36 = arith.select %34, %8, %35 : vector<128x128xi1>, vector<128x128xf32>
      %cst_18 = arith.constant dense<0.000000e+00> : vector<128xf32>
      %37 = vector.multi_reduction <add>, %36, %cst_18 [1] : vector<128x128xf32> to vector<128xf32>
      %38 = vector.shape_cast %37 : vector<128xf32> to vector<128x1xf32>
      %c0_19 = arith.constant 0 : index
      %c0_20 = arith.constant 0 : index
      %39 = vector.load %arg7[%c0_19, %c0_20] : memref<128x1xf32, #tpu.memory_space<vmem>>, vector<128x1xf32>
      tpu.vector_store %arg7[%c0_19, %c0_20], %38 {strides = array<i32>} : memref<128x1xf32, #tpu.memory_space<vmem>>, vector<128x1xf32>,
    } else {
    }
    %c0_4 = arith.constant 0 : index
    %c0_5 = arith.constant 0 : index
    %12 = vector.load %arg5[%c0_4, %c0_5] : memref<128x1xf32, #tpu.memory_space<vmem>>, vector<128x1xf32>
    %cst_6 = arith.constant dense<0xFF800000> : vector<128xf32>
    %13 = vector.multi_reduction <maximumf>, %8, %cst_6 [1] : vector<128x128xf32> to vector<128xf32>
    %14 = vector.shape_cast %13 : vector<128xf32> to vector<128x1xf32>
    %15 = arith.maximumf %12, %14 : vector<128x1xf32>
    %c0_7 = arith.constant 0 : index
    %c0_8 = arith.constant 0 : index
    %16 = vector.load %arg6[%c0_7, %c0_8] : memref<128x1xf32, #tpu.memory_space<vmem>>, vector<128x1xf32>
    %c0_9 = arith.constant 0 : index
    %c0_10 = arith.constant 0 : index
    %17 = vector.load %arg5[%c0_9, %c0_10] : memref<128x1xf32, #tpu.memory_space<vmem>>, vector<128x1xf32>
    %18 = arith.subf %17, %15 : vector<128x1xf32>
    %19 = math.exp %18 : vector<128x1xf32>
    %20 = arith.mulf %16, %19 : vector<128x1xf32>
    %21 = vector.broadcast %15 : vector<128x1xf32> to vector<128x128xf32>
    %22 = arith.subf %8, %21 : vector<128x128xf32>
    %23 = math.exp %22 : vector<128x128xf32>
    %cst_11 = arith.constant dense<0.000000e+00> : vector<128xf32>
    %24 = vector.multi_reduction <add>, %23, %cst_11 [1] : vector<128x128xf32> to vector<128xf32>
    %25 = vector.shape_cast %24 : vector<128xf32> to vector<128x1xf32>
    %26 = arith.addf %20, %25 : vector<128x1xf32>
    %c0_12 = arith.constant 0 : index
    %c0_13 = arith.constant 0 : index
    %27 = vector.load %arg6[%c0_12, %c0_13] : memref<128x1xf32, #tpu.memory_space<vmem>>, vector<128x1xf32>
    tpu.vector_store %arg6[%c0_12, %c0_13], %26 {strides = array<i32>} : memref<128x1xf32, #tpu.memory_space<vmem>>, vector<128x1xf32>,
    %c0_14 = arith.constant 0 : index
    %c0_15 = arith.constant 0 : index
    %28 = vector.load %arg5[%c0_14, %c0_15] : memref<128x1xf32, #tpu.memory_space<vmem>>, vector<128x1xf32>
    tpu.vector_store %arg5[%c0_14, %c0_15], %15 {strides = array<i32>} : memref<128x1xf32, #tpu.memory_space<vmem>>, vector<128x1xf32>,
    %c1_i32 = arith.constant 1 : i32
    %29 = arith.cmpi eq, %arg1, %c1_i32 : i32
    %30 = arith.extui %29 : i1 to i32
    %c0_i32_16 = arith.constant 0 : i32
    %31 = arith.cmpi ne, %30, %c0_i32_16 : i32
    scf.if %31 {
      %c0_17 = arith.constant 0 : index
      %c0_18 = arith.constant 0 : index
      %32 = vector.load %arg7[%c0_17, %c0_18] : memref<128x1xf32, #tpu.memory_space<vmem>>, vector<128x1xf32>
      %c0_19 = arith.constant 0 : index
      %c0_20 = arith.constant 0 : index
      %33 = vector.load %arg5[%c0_19, %c0_20] : memref<128x1xf32, #tpu.memory_space<vmem>>, vector<128x1xf32>
      %c0_21 = arith.constant 0 : index
      %c0_22 = arith.constant 0 : index
      %34 = vector.load %arg6[%c0_21, %c0_22] : memref<128x1xf32, #tpu.memory_space<vmem>>, vector<128x1xf32>
      %35 = math.log %34 : vector<128x1xf32>
      %36 = arith.addf %33, %35 : vector<128x1xf32>
      %37 = arith.subf %32, %36 : vector<128x1xf32>
      %c0_23 = arith.constant 0 : index
      %c0_24 = arith.constant 0 : index
      %38 = vector.load %arg4[%c0_23, %c0_24] : memref<128x1xf32, #tpu.memory_space<vmem>>, vector<128x1xf32>
      tpu.vector_store %arg4[%c0_23, %c0_24], %37 {strides = array<i32>} : memref<128x1xf32, #tpu.memory_space<vmem>>, vector<128x1xf32>,
    } else {
    }
    return
  }
  func.func @transform_0(%arg0: i32, %arg1: i32) -> (i32, i32) {
    %c0_i32 = arith.constant 0 : i32
    %c0_i32_0 = arith.constant 0 : i32
    return %arg0, %c0_i32 : i32, i32
  }
  func.func @transform_1(%arg0: i32, %arg1: i32) -> (i32, i32) {
    %c0_i32 = arith.constant 0 : i32
    %c0_i32_0 = arith.constant 0 : i32
    %c0_i32_1 = arith.constant 0 : i32
    return %c0_i32, %c0_i32_0 : i32, i32
  }
  func.func @transform_2(%arg0: i32, %arg1: i32) -> (i32, i32) {
    %c0_i32 = arith.constant 0 : i32
    %c0_i32_0 = arith.constant 0 : i32
    return %arg0, %c0_i32 : i32, i32
  }
}

</mosaic_0001>

<bundles_post_ra>
// kernel: tpu_custom_call.1
= control target key start
LH: loop header
LB: loop body
LE: loop exit
PB: predicated region body
PF: predicated region fallthrough
CT: control target
= control target key end

     0   :  { %s1513_s9 = smov 0   ;;  %s1515_s10 = smov 0   ;;  %s2095_s0 = inlined_call_operand.vmem [shape: f32[256,32], index: 0, kind: input, shape index: {}]   ;;  %s2096_s1 = inlined_call_operand.vmem [shape: f32[256,32], index: 1, kind: input, shape index: {}]   ;;  %s2097_s2 = inlined_call_operand.vmem [shape: f32[256,1], index: 2, kind: output, shape index: {}]  }
   0x1   :  { %s1517_s11 = smov 0   ;;  %s1519_s12 = smov 0  }
   0x2   :  { %s1521_s13 = smov 0  }
   0x3 LB: > { %s21_s14 = sadd.s32 1, %s1485_s11  ;;  %s24_s15 = sadd.s32 1, %s1489_s12  ;;  %s1493_s13 = sphi %s1521_s13, %s12_s13   ;;  %s1489_s12 = sphi %s1519_s12, %s2114_s12   ;;  %s1485_s11 = sphi %s1517_s11, %s2113_s11   ;;  %s1481_s10 = sphi %s1515_s10, %s2112_s10   ;;  %s1477_s9 = sphi %s1513_s9, %s2111_s9  }
   0x4   : > { %p22_p0 = scmp.ge.s32.totalorder %s21_s14, 2  ;;  %p1151_p1 = scmp.ge.s32.totalorder %s1493_s13, 1 }
   0x5   : > { %p125_p2 = scmp.lt.s32.totalorder %s1493_s13, 5 }
   0x6   : > { %s2116_s14 = smov (%p22_p0, %s21_s14), 0  ;;  %s2118_s15 = smov (!%p22_p0, %s24_s15), %s1489_s12 }
   0x7   : > { %p126_p3 = pnand %p1151_p1, %p125_p2  ;;  %p26_p4 = scmp.ge.s32.totalorder %s2118_s15, 2 }
   0x8   : > { %s1152_s16 = sshll.u32 (!%p126_p3), %s1481_s10, 4  ;;  %p1156_p6 = scmp.ne.s32.totalorder (!%p126_p3), %s1477_s9, 0 }
   0x9   : > { %s2120_s15 = smov (%p26_p4, %s2118_s15), 0  ;;  %129 = sbr.rel (%p126_p3) target bundleno = 997 (0x3e5), region = 28 }
   0xa   : > { %p148_p5 = scmp.lt.s32.totalorder (!%p126_p3), %s1152_s16, 31 }
   0xe   : > { %s2122_s16 = smov (!%p148_p5, %s1152_s16), 31  ;;  %162 = sbr.rel (%p1156_p6) target bundleno = 44 (0x2c), region = 32 }
   0xf   : > { %s1153_s17 = sshll.u32 %s2122_s16, 3 }
  0x10   : > { %s1551_s20 = scalar_lea.vmem %s2095_s0, %s1153_s17  ;;  %s1556_s23 = scalar_lea.vmem %s2097_s2, %s1153_s17 }
  0x13   : > { %vm163_vm0 = vcmask 7168   ;;  %v1495_v0 = vmov -inf   ;;  %v1496_v1 = vmov 0.0  }
  0x14   : > { %164 = vst.msk [vmem:[#allocation2] sm:$0xff] %vm163_vm0, %v1495_v0  ;;  %165 = vst.msk [vmem:[#allocation2 + $0x8] sm:$0xff] %vm163_vm0, %v1495_v0 }
  0x15   : > { %166 = vst.msk [vmem:[#allocation2 + $0x10] sm:$0xff] %vm163_vm0, %v1495_v0  ;;  %167 = vst.msk [vmem:[#allocation2 + $0x18] sm:$0xff] %vm163_vm0, %v1495_v0 }
  0x16   : > { %168 = vst.msk [vmem:[#allocation2 + $0x20] sm:$0xff] %vm163_vm0, %v1495_v0  ;;  %169 = vst.msk [vmem:[#allocation2 + $0x28] sm:$0xff] %vm163_vm0, %v1495_v0 }
  0x17   : > { %170 = vst.msk [vmem:[#allocation2 + $0x30] sm:$0xff] %vm163_vm0, %v1495_v0  ;;  %171 = vst.msk [vmem:[#allocation2 + $0x38] sm:$0xff] %vm163_vm0, %v1495_v0 }
  0x18   : > { %172 = vst.msk [vmem:[#allocation2 + $0x40] sm:$0xff] %vm163_vm0, %v1495_v0  ;;  %173 = vst.msk [vmem:[#allocation2 + $0x48] sm:$0xff] %vm163_vm0, %v1495_v0 }
  0x19   : > { %174 = vst.msk [vmem:[#allocation2 + $0x50] sm:$0xff] %vm163_vm0, %v1495_v0  ;;  %175 = vst.msk [vmem:[#allocation2 + $0x58] sm:$0xff] %vm163_vm0, %v1495_v0 }
  0x1a   : > { %176 = vst.msk [vmem:[#allocation2 + $0x60] sm:$0xff] %vm163_vm0, %v1495_v0  ;;  %177 = vst.msk [vmem:[#allocation2 + $0x68] sm:$0xff] %vm163_vm0, %v1495_v0 }
  0x1b   : > { %178 = vst.msk [vmem:[#allocation2 + $0x70] sm:$0xff] %vm163_vm0, %v1495_v0  ;;  %179 = vst.msk [vmem:[#allocation2 + $0x78] sm:$0xff] %vm163_vm0, %v1495_v0 }
  0x1c   : > { %180 = vst.msk [vmem:[#allocation3] sm:$0xff] %vm163_vm0, %v1496_v1  ;;  %181 = vst.msk [vmem:[#allocation3 + $0x8] sm:$0xff] %vm163_vm0, %v1496_v1 }
  0x1d   : > { %182 = vst.msk [vmem:[#allocation3 + $0x10] sm:$0xff] %vm163_vm0, %v1496_v1  ;;  %183 = vst.msk [vmem:[#allocation3 + $0x18] sm:$0xff] %vm163_vm0, %v1496_v1 }
  0x1e   : > { %184 = vst.msk [vmem:[#allocation3 + $0x20] sm:$0xff] %vm163_vm0, %v1496_v1  ;;  %185 = vst.msk [vmem:[#allocation3 + $0x28] sm:$0xff] %vm163_vm0, %v1496_v1 }
  0x1f   : > { %186 = vst.msk [vmem:[#allocation3 + $0x30] sm:$0xff] %vm163_vm0, %v1496_v1  ;;  %187 = vst.msk [vmem:[#allocation3 + $0x38] sm:$0xff] %vm163_vm0, %v1496_v1 }
  0x20   : > { %188 = vst.msk [vmem:[#allocation3 + $0x40] sm:$0xff] %vm163_vm0, %v1496_v1  ;;  %189 = vst.msk [vmem:[#allocation3 + $0x48] sm:$0xff] %vm163_vm0, %v1496_v1 }
  0x21   : > { %190 = vst.msk [vmem:[#allocation3 + $0x50] sm:$0xff] %vm163_vm0, %v1496_v1  ;;  %191 = vst.msk [vmem:[#allocation3 + $0x58] sm:$0xff] %vm163_vm0, %v1496_v1 }
  0x22   : > { %192 = vst.msk [vmem:[#allocation3 + $0x60] sm:$0xff] %vm163_vm0, %v1496_v1  ;;  %193 = vst.msk [vmem:[#allocation3 + $0x68] sm:$0xff] %vm163_vm0, %v1496_v1 }
  0x23   : > { %194 = vst.msk [vmem:[#allocation3 + $0x70] sm:$0xff] %vm163_vm0, %v1496_v1  ;;  %195 = vst.msk [vmem:[#allocation3 + $0x78] sm:$0xff] %vm163_vm0, %v1496_v1 }
  0x24   : > { %196 = vst.msk [vmem:[#allocation4] sm:$0xff] %vm163_vm0, %v1496_v1  ;;  %197 = vst.msk [vmem:[#allocation4 + $0x8] sm:$0xff] %vm163_vm0, %v1496_v1 }
  0x25   : > { %198 = vst.msk [vmem:[#allocation4 + $0x10] sm:$0xff] %vm163_vm0, %v1496_v1  ;;  %199 = vst.msk [vmem:[#allocation4 + $0x18] sm:$0xff] %vm163_vm0, %v1496_v1 }
  0x26   : > { %200 = vst.msk [vmem:[#allocation4 + $0x20] sm:$0xff] %vm163_vm0, %v1496_v1  ;;  %201 = vst.msk [vmem:[#allocation4 + $0x28] sm:$0xff] %vm163_vm0, %v1496_v1 }
  0x27   : > { %202 = vst.msk [vmem:[#allocation4 + $0x30] sm:$0xff] %vm163_vm0, %v1496_v1  ;;  %203 = vst.msk [vmem:[#allocation4 + $0x38] sm:$0xff] %vm163_vm0, %v1496_v1 }
  0x28   : > { %204 = vst.msk [vmem:[#allocation4 + $0x40] sm:$0xff] %vm163_vm0, %v1496_v1  ;;  %205 = vst.msk [vmem:[#allocation4 + $0x48] sm:$0xff] %vm163_vm0, %v1496_v1 }
  0x29   : > { %206 = vst.msk [vmem:[#allocation4 + $0x50] sm:$0xff] %vm163_vm0, %v1496_v1  ;;  %207 = vst.msk [vmem:[#allocation4 + $0x58] sm:$0xff] %vm163_vm0, %v1496_v1 }
  0x2a   : > { %208 = vst.msk [vmem:[#allocation4 + $0x60] sm:$0xff] %vm163_vm0, %v1496_v1  ;;  %209 = vst.msk [vmem:[#allocation4 + $0x68] sm:$0xff] %vm163_vm0, %v1496_v1 }
  0x2b   : > { %210 = vst.msk [vmem:[#allocation4 + $0x70] sm:$0xff] %vm163_vm0, %v1496_v1  ;;  %211 = vst.msk [vmem:[#allocation4 + $0x78] sm:$0xff] %vm163_vm0, %v1496_v1 }
  0x2c PF: > { %s1157_s24 = sshll.u32 %s1477_s9, 7  ;;  %vm246_vm1 = vcmask 261120   ;;  %v230_v2 = vld [vmem:[%s1551_s20] sm:$0xff]  ;;  %v231_v20 = vld [vmem:[%s1551_s20 + $0x8] sm:$0xff]  ;;  %v232_v22 = vld [vmem:[%s1551_s20 + $0x10] sm:$0xff]  ;;  %p1190_p7 = scmp.ne.s32.totalorder %s1481_s10, %s1477_s9 }
  0x2d   : > { %v238_v3 = vld [vmem:[%s1551_s20 + $0x40] sm:$0xff]  ;;  %s1613_s27 = scalar_lea.vmem %s2096_s1, %s1157_s24  ;;  %1258 = vmatprep.mubr.msk.f32.mxu0 %vm246_vm1, %v230_v2  ;;  %v239_v21 = vld [vmem:[%s1551_s20 + $0x48] sm:$0xff]  ;;  %v240_v23 = vld [vmem:[%s1551_s20 + $0x50] sm:$0xff] }
  0x2e   : > { %1270 = vmatprep.mubr.msk.f32.mxu1 %vm246_vm1, %v238_v3  ;;  %v229_v4 = vld [vmem:[%s1613_s27 + $0x78] sm:$0xff]  ;;  %v228_v5 = vld [vmem:[%s1613_s27 + $0x70] sm:$0xff]  ;;  %v227_v6 = vld [vmem:[%s1613_s27 + $0x68] sm:$0xff] }
  0x2f   : > { %1226 = vmatprep.subr.msk.mxu0 %vm246_vm1, %v229_v4  ;;  %1282 = vmatprep.subr.msk.mxu1 %vm246_vm1, %v229_v4  ;;  %v226_v7 = vld [vmem:[%s1613_s27 + $0x60] sm:$0xff]  ;;  %v225_v8 = vld [vmem:[%s1613_s27 + $0x58] sm:$0xff]  ;;  %v224_v9 = vld [vmem:[%s1613_s27 + $0x50] sm:$0xff] }
  0x30   : > { %1227 = vmatpush3.xpose.msk.msra.mxu0 %vm246_vm1, %v229_v4  ;;  %1298 = vmatpush3.xpose.msk.msra.mxu1 %vm246_vm1, %v229_v4  ;;  %v223_v10 = vld [vmem:[%s1613_s27 + $0x48] sm:$0xff]  ;;  %v222_v11 = vld [vmem:[%s1613_s27 + $0x40] sm:$0xff]  ;;  %v221_v12 = vld [vmem:[%s1613_s27 + $0x38] sm:$0xff] }
  0x31   : > { %1228 = vmatprep.subr.msk.mxu0 %vm246_vm1, %v228_v5  ;;  %1283 = vmatprep.subr.msk.mxu1 %vm246_vm1, %v228_v5  ;;  %v220_v13 = vld [vmem:[%s1613_s27 + $0x30] sm:$0xff]  ;;  %v219_v14 = vld [vmem:[%s1613_s27 + $0x28] sm:$0xff]  ;;  %v218_v15 = vld [vmem:[%s1613_s27 + $0x20] sm:$0xff] }
  0x32   : > { %v217_v16 = vld [vmem:[%s1613_s27 + $0x18] sm:$0xff]  ;;  %v216_v17 = vld [vmem:[%s1613_s27 + $0x10] sm:$0xff]  ;;  %v215_v18 = vld [vmem:[%s1613_s27 + $0x8] sm:$0xff] }
  0x33   : > { %v214_v19 = vld [vmem:[%s1613_s27] sm:$0xff]  ;;  %v233_v24 = vld [vmem:[%s1551_s20 + $0x18] sm:$0xff]  ;;  %v235_v28 = vld [vmem:[%s1551_s20 + $0x28] sm:$0xff] }
  0x34   : > { %1229 = vmatpush3.xpose.msk.msra.mxu0 %vm246_vm1, %v228_v5  ;;  %1299 = vmatpush3.xpose.msk.msra.mxu1 %vm246_vm1, %v228_v5  ;;  %v241_v25 = vld [vmem:[%s1551_s20 + $0x58] sm:$0xff]  ;;  %v234_v26 = vld [vmem:[%s1551_s20 + $0x20] sm:$0xff]  ;;  %v243_v29 = vld [vmem:[%s1551_s20 + $0x68] sm:$0xff] }
  0x35   : > { %1230 = vmatprep.subr.msk.mxu0 %vm246_vm1, %v227_v6  ;;  %1284 = vmatprep.subr.msk.mxu1 %vm246_vm1, %v227_v6  ;;  %v242_v27 = vld [vmem:[%s1551_s20 + $0x60] sm:$0xff]  ;;  %v236_v30 = vld [vmem:[%s1551_s20 + $0x30] sm:$0xff]  ;;  %v237_v32 = vld [vmem:[%s1551_s20 + $0x38] sm:$0xff] }
  0x36   : > { %v244_v31 = vld [vmem:[%s1551_s20 + $0x70] sm:$0xff]  ;;  %v245_v33 = vld [vmem:[%s1551_s20 + $0x78] sm:$0xff] }
  0x38   : > { %1231 = vmatpush3.xpose.msk.msra.mxu0 %vm246_vm1, %v227_v6  ;;  %1300 = vmatpush3.xpose.msk.msra.mxu1 %vm246_vm1, %v227_v6 }
  0x39   : > { %1232 = vmatprep.subr.msk.mxu0 %vm246_vm1, %v226_v7  ;;  %1285 = vmatprep.subr.msk.mxu1 %vm246_vm1, %v226_v7 }
  0x3c   : > { %1233 = vmatpush3.xpose.msk.msra.mxu0 %vm246_vm1, %v226_v7  ;;  %1301 = vmatpush3.xpose.msk.msra.mxu1 %vm246_vm1, %v226_v7 }
  0x3d   : > { %1234 = vmatprep.subr.msk.mxu0 %vm246_vm1, %v225_v8  ;;  %1286 = vmatprep.subr.msk.mxu1 %vm246_vm1, %v225_v8 }
  0x40   : > { %1235 = vmatpush3.xpose.msk.msra.mxu0 %vm246_vm1, %v225_v8  ;;  %1302 = vmatpush3.xpose.msk.msra.mxu1 %vm246_vm1, %v225_v8 }
  0x41   : > { %1236 = vmatprep.subr.msk.mxu0 %vm246_vm1, %v224_v9  ;;  %1287 = vmatprep.subr.msk.mxu1 %vm246_vm1, %v224_v9 }
  0x44   : > { %1237 = vmatpush3.xpose.msk.msra.mxu0 %vm246_vm1, %v224_v9  ;;  %1303 = vmatpush3.xpose.msk.msra.mxu1 %vm246_vm1, %v224_v9 }
  0x45   : > { %1238 = vmatprep.subr.msk.mxu0 %vm246_vm1, %v223_v10  ;;  %1288 = vmatprep.subr.msk.mxu1 %vm246_vm1, %v223_v10 }
  0x48   : > { %1239 = vmatpush3.xpose.msk.msra.mxu0 %vm246_vm1, %v223_v10  ;;  %1304 = vmatpush3.xpose.msk.msra.mxu1 %vm246_vm1, %v223_v10 }
  0x49   : > { %1240 = vmatprep.subr.msk.mxu0 %vm246_vm1, %v222_v11  ;;  %1289 = vmatprep.subr.msk.mxu1 %vm246_vm1, %v222_v11 }
  0x4c   : > { %1241 = vmatpush3.xpose.msk.msra.mxu0 %vm246_vm1, %v222_v11  ;;  %1305 = vmatpush3.xpose.msk.msra.mxu1 %vm246_vm1, %v222_v11 }
  0x4d   : > { %1242 = vmatprep.subr.msk.mxu0 %vm246_vm1, %v221_v12  ;;  %1290 = vmatprep.subr.msk.mxu1 %vm246_vm1, %v221_v12 }
  0x50   : > { %1243 = vmatpush3.xpose.msk.msra.mxu0 %vm246_vm1, %v221_v12  ;;  %1306 = vmatpush3.xpose.msk.msra.mxu1 %vm246_vm1, %v221_v12 }
  0x51   : > { %1244 = vmatprep.subr.msk.mxu0 %vm246_vm1, %v220_v13  ;;  %1291 = vmatprep.subr.msk.mxu1 %vm246_vm1, %v220_v13 }
  0x54   : > { %1245 = vmatpush3.xpose.msk.msra.mxu0 %vm246_vm1, %v220_v13  ;;  %1307 = vmatpush3.xpose.msk.msra.mxu1 %vm246_vm1, %v220_v13 }
  0x55   : > { %1246 = vmatprep.subr.msk.mxu0 %vm246_vm1, %v219_v14  ;;  %1292 = vmatprep.subr.msk.mxu1 %vm246_vm1, %v219_v14 }
  0x58   : > { %1247 = vmatpush3.xpose.msk.msra.mxu0 %vm246_vm1, %v219_v14  ;;  %1308 = vmatpush3.xpose.msk.msra.mxu1 %vm246_vm1, %v219_v14 }
  0x59   : > { %1248 = vmatprep.subr.msk.mxu0 %vm246_vm1, %v218_v15  ;;  %1293 = vmatprep.subr.msk.mxu1 %vm246_vm1, %v218_v15 }
  0x5c   : > { %1249 = vmatpush3.xpose.msk.msra.mxu0 %vm246_vm1, %v218_v15  ;;  %1309 = vmatpush3.xpose.msk.msra.mxu1 %vm246_vm1, %v218_v15 }
  0x5d   : > { %1250 = vmatprep.subr.msk.mxu0 %vm246_vm1, %v217_v16  ;;  %1294 = vmatprep.subr.msk.mxu1 %vm246_vm1, %v217_v16 }
  0x60   : > { %1251 = vmatpush3.xpose.msk.msra.mxu0 %vm246_vm1, %v217_v16  ;;  %1310 = vmatpush3.xpose.msk.msra.mxu1 %vm246_vm1, %v217_v16 }
  0x61   : > { %1252 = vmatprep.subr.msk.mxu0 %vm246_vm1, %v216_v17  ;;  %1295 = vmatprep.subr.msk.mxu1 %vm246_vm1, %v216_v17 }
  0x64   : > { %1253 = vmatpush3.xpose.msk.msra.mxu0 %vm246_vm1, %v216_v17  ;;  %1311 = vmatpush3.xpose.msk.msra.mxu1 %vm246_vm1, %v216_v17 }
  0x65   : > { %1254 = vmatprep.subr.msk.mxu0 %vm246_vm1, %v215_v18  ;;  %1296 = vmatprep.subr.msk.mxu1 %vm246_vm1, %v215_v18 }
  0x68   : > { %1255 = vmatpush3.xpose.msk.msra.mxu0 %vm246_vm1, %v215_v18  ;;  %1312 = vmatpush3.xpose.msk.msra.mxu1 %vm246_vm1, %v215_v18 }
  0x69   : > { %1256 = vmatprep.subr.msk.mxu0 %vm246_vm1, %v214_v19  ;;  %1297 = vmatprep.subr.msk.mxu1 %vm246_vm1, %v214_v19 }
  0x6c   : > { %1257 = vmatpush3.xpose.msk.msra.mxu0 %vm246_vm1, %v214_v19  ;;  %1313 = vmatpush3.xpose.msk.msra.mxu1 %vm246_vm1, %v214_v19 }
  0x6f   : > { %1259 = vmatmul.mubr.msk.f32.vlgmr.msra.gmra.mxu0 %vm246_vm1, %v231_v20  ;;  %1271 = vmatmul.mubr.msk.f32.vlgmr.msra.gmra.mxu1 %vm246_vm1, %v239_v21 }
  0x70   : > { %1261 = vmatprep.mubr.msk.f32.mxu0 %vm246_vm1, %v232_v22  ;;  %1273 = vmatprep.mubr.msk.f32.mxu1 %vm246_vm1, %v240_v23 }
  0x73   : > { %1262 = vmatmul.mubr.msk.f32.gmra.mxu0 %vm246_vm1, %v233_v24  ;;  %1274 = vmatmul.mubr.msk.f32.gmra.mxu1 %vm246_vm1, %v241_v25 }
  0x74   : > { %1264 = vmatprep.mubr.msk.f32.mxu0 %vm246_vm1, %v234_v26  ;;  %1276 = vmatprep.mubr.msk.f32.mxu1 %vm246_vm1, %v242_v27 }
  0x77   : > { %1265 = vmatmul.mubr.msk.f32.gmra.mxu0 %vm246_vm1, %v235_v28  ;;  %1277 = vmatmul.mubr.msk.f32.gmra.mxu1 %vm246_vm1, %v243_v29 }
  0x78   : > { %1267 = vmatprep.mubr.msk.f32.mxu0 %vm246_vm1, %v236_v30  ;;  %1279 = vmatprep.mubr.msk.f32.mxu1 %vm246_vm1, %v244_v31 }
  0x7b   : > { %1268 = vmatmul.mubr.msk.f32.gmra.mxu0 %vm246_vm1, %v237_v32  ;;  %1280 = vmatmul.mubr.msk.f32.gmra.mxu1 %vm246_vm1, %v245_v33 }
 0x12f   : > { %v1725_v34 = vpop.f32.mrf.mxu0  ;;  %v1727_v35 = vpop.f32.mrf.mxu1 }
 0x131   : > { %v1729_v36 = vpop.f32.mrf.mxu0  ;;  %v1731_v37 = vpop.f32.mrf.mxu1 }
 0x133   : > { %v1733_v38 = vpop.f32.mrf.mxu0  ;;  %v1735_v39 = vpop.f32.mrf.mxu1 }
 0x135   : > { %v1737_v40 = vpop.f32.mrf.mxu0  ;;  %v1739_v41 = vpop.f32.mrf.mxu1 }
 0x137   : > { %v1741_v42 = vpop.f32.mrf.mxu0  ;;  %v1743_v43 = vpop.f32.mrf.mxu1 }
 0x139   : > { %v1745_v44 = vpop.f32.mrf.mxu0  ;;  %v1747_v45 = vpop.f32.mrf.mxu1  ;;  %491 = sbr.rel (%p1190_p7) target bundleno = 493 (0x1ed), region = 36 }
 0x13b   : > { %v1749_v46 = vpop.f32.mrf.mxu0  ;;  %v1751_v47 = vpop.f32.mrf.mxu1 }
 0x13d   : > { %v1753_v48 = vpop.f32.mrf.mxu0  ;;  %v1755_v49 = vpop.f32.mrf.mxu1 }
 0x13e   : > { %v492_v50 = vlaneseq }
 0x140   : > { %v493_v51 = vshrl.u32 %v492_v50, 7  ;;  %v510_v52 = vand.u32 127, %v492_v50 }
 0x142   : > { %vm511_vm2 = vcmp.eq.s32.totalorder %v493_v51, %v510_v52  ;;  %v495_v53 = vadd.s32 16, %v493_v51  ;;  %v496_v54 = vadd.s32 24, %v493_v51  ;;  %v494_v55 = vadd.s32 8, %v493_v51 }
 0x143   : > { %v527_v56 = vsel %vm511_vm2, %v1729_v36, 0.0  ;;  %v497_v57 = vadd.s32 32, %v493_v51  ;;  %v498_v58 = vadd.s32 40, %v493_v51  ;;  %v499_v61 = vadd.s32 48, %v493_v51 }
 0x144   : > { %543 = vadd.xlane.f32.xlu0 %v527_v56  ;;  %vm513_vm3 = vcmp.eq.s32.totalorder %v495_v53, %v510_v52  ;;  %vm514_vm4 = vcmp.eq.s32.totalorder %v496_v54, %v510_v52  ;;  %vm512_vm5 = vcmp.eq.s32.totalorder %v494_v55, %v510_v52  ;;  %v500_v63 = vadd.s32 56, %v493_v51 }
 0x145   : > { %v529_v59 = vsel %vm513_vm3, %v1737_v40, 0.0  ;;  %v528_v60 = vsel %vm512_vm5, %v1725_v34, 0.0  ;;  %vm515_vm6 = vcmp.eq.s32.totalorder %v497_v57, %v510_v52  ;;  %v530_v62 = vsel %vm514_vm4, %v1733_v38, 0.0 }
 0x146   : > { %547 = vadd.xlane.f32.xlu1 %v529_v59  ;;  %vm516_vm7 = vcmp.eq.s32.totalorder %v498_v58, %v510_v52  ;;  %v531_v0 = vsel %vm515_vm6, %v1745_v44, 0.0  ;;  %vm517_vm8 = vcmp.eq.s32.totalorder %v499_v61, %v510_v52  ;;  %v501_v1 = vadd.s32 64, %v493_v51 }
 0x147   : > { %v532_v2 = vsel %vm516_vm7, %v1741_v42, 0.0  ;;  %vm518_vm9 = vcmp.eq.s32.totalorder %v500_v63, %v510_v52  ;;  %v502_v3 = vadd.s32 72, %v493_v51  ;;  %v533_v4 = vsel %vm517_vm8, %v1753_v48, 0.0 }
 0x148   : > { %545 = vadd.xlane.f32.xlu0 %v528_v60  ;;  %vm519_vm10 = vcmp.eq.s32.totalorder %v501_v1, %v510_v52  ;;  %v503_v5 = vadd.s32 80, %v493_v51  ;;  %v534_v6 = vsel %vm518_vm9, %v1749_v46, 0.0  ;;  %v504_v7 = vadd.s32 88, %v493_v51 }
 0x149   : > { %vm520_vm11 = vcmp.eq.s32.totalorder %v502_v3, %v510_v52  ;;  %v535_v8 = vsel %vm519_vm10, %v1731_v37, 0.0  ;;  %v505_v9 = vadd.s32 96, %v493_v51  ;;  %v506_v11 = vadd.s32 104, %v493_v51 }
 0x14a   : > { %549 = vadd.xlane.f32.xlu1 %v530_v62  ;;  %vm521_vm12 = vcmp.eq.s32.totalorder %v503_v5, %v510_v52  ;;  %v536_v10 = vsel %vm520_vm11, %v1727_v35, 0.0  ;;  %vm522_vm13 = vcmp.eq.s32.totalorder %v504_v7, %v510_v52  ;;  %v507_v13 = vadd.s32 112, %v493_v51 }
 0x14b   : > { %v537_v12 = vsel %vm521_vm12, %v1739_v41, 0.0  ;;  %vm523_vm14 = vcmp.eq.s32.totalorder %v505_v9, %v510_v52  ;;  %v538_v14 = vsel %vm522_vm13, %v1735_v39, 0.0  ;;  %vm524_vm15 = vcmp.eq.s32.totalorder %v506_v11, %v510_v52 }
 0x14c   : > { %551 = vadd.xlane.f32.xlu0 %v531_v0  ;;  %v508_v15 = vadd.s32 120, %v493_v51  ;;  %v539_v16 = vsel %vm523_vm14, %v1747_v45, 0.0  ;;  %vm525_vm0 = vcmp.eq.s32.totalorder %v507_v13, %v510_v52  ;;  %v540_v17 = vsel %vm524_vm15, %v1743_v43, 0.0 }
 0x14d   : > { %v541_v18 = vsel %vm525_vm0, %v1755_v49, 0.0  ;;  %vm575_vm2 = vcmask 7168  }
 0x14e   : > { %553 = vadd.xlane.f32.xlu1 %v532_v2  ;;  %vm526_vm1 = vcmp.eq.s32.totalorder %v508_v15, %v510_v52 }
 0x14f   : > { %v542_v19 = vsel %vm526_vm1, %v1751_v47, 0.0 }
 0x150   : > { %555 = vadd.xlane.f32.xlu0 %v533_v4 }
 0x152   : > { %557 = vadd.xlane.f32.xlu1 %v534_v6 }
 0x154   : > { %559 = vadd.xlane.f32.xlu0 %v535_v8 }
 0x156   : > { %561 = vadd.xlane.f32.xlu1 %v536_v10 }
 0x158   : > { %563 = vadd.xlane.f32.xlu0 %v537_v12 }
 0x15a   : > { %565 = vadd.xlane.f32.xlu1 %v538_v14 }
 0x15c   : > { %567 = vadd.xlane.f32.xlu0 %v539_v16 }
 0x15e   : > { %569 = vadd.xlane.f32.xlu1 %v540_v17 }
 0x160   : > { %571 = vadd.xlane.f32.xlu0 %v541_v18 }
 0x162   : > { %573 = vadd.xlane.f32.xlu1 %v542_v19 }
 0x1cd   : > { %v544_v20 = vpop.xlane.xlu0 %543 }
 0x1ce   : > { %576 = vst.msk [vmem:[#allocation4] sm:$0xff] %vm575_vm2, %v544_v20 }
 0x1cf   : > { %v548_v21 = vpop.xlane.xlu1 %547 }
 0x1d0   : > { %578 = vst.msk [vmem:[#allocation4 + $0x10] sm:$0xff] %vm575_vm2, %v548_v21 }
 0x1d1   : > { %v546_v22 = vpop.xlane.xlu0 %545 }
 0x1d2   : > { %577 = vst.msk [vmem:[#allocation4 + $0x8] sm:$0xff] %vm575_vm2, %v546_v22 }
 0x1d3   : > { %v550_v23 = vpop.xlane.xlu1 %549 }
 0x1d4   : > { %579 = vst.msk [vmem:[#allocation4 + $0x18] sm:$0xff] %vm575_vm2, %v550_v23 }
 0x1d5   : > { %v552_v24 = vpop.xlane.xlu0 %551 }
 0x1d6   : > { %580 = vst.msk [vmem:[#allocation4 + $0x20] sm:$0xff] %vm575_vm2, %v552_v24 }
 0x1d7   : > { %v554_v25 = vpop.xlane.xlu1 %553 }
 0x1d8   : > { %581 = vst.msk [vmem:[#allocation4 + $0x28] sm:$0xff] %vm575_vm2, %v554_v25 }
 0x1d9   : > { %v556_v26 = vpop.xlane.xlu0 %555 }
 0x1da   : > { %582 = vst.msk [vmem:[#allocation4 + $0x30] sm:$0xff] %vm575_vm2, %v556_v26 }
 0x1db   : > { %v558_v27 = vpop.xlane.xlu1 %557 }
 0x1dc   : > { %583 = vst.msk [vmem:[#allocation4 + $0x38] sm:$0xff] %vm575_vm2, %v558_v27 }
 0x1dd   : > { %v560_v28 = vpop.xlane.xlu0 %559 }
 0x1de   : > { %584 = vst.msk [vmem:[#allocation4 + $0x40] sm:$0xff] %vm575_vm2, %v560_v28 }
 0x1df   : > { %v562_v29 = vpop.xlane.xlu1 %561 }
 0x1e0   : > { %585 = vst.msk [vmem:[#allocation4 + $0x48] sm:$0xff] %vm575_vm2, %v562_v29 }
 0x1e1   : > { %v564_v30 = vpop.xlane.xlu0 %563 }
 0x1e2   : > { %586 = vst.msk [vmem:[#allocation4 + $0x50] sm:$0xff] %vm575_vm2, %v564_v30 }
 0x1e3   : > { %v566_v31 = vpop.xlane.xlu1 %565 }
 0x1e4   : > { %587 = vst.msk [vmem:[#allocation4 + $0x58] sm:$0xff] %vm575_vm2, %v566_v31 }
 0x1e5   : > { %v568_v32 = vpop.xlane.xlu0 %567 }
 0x1e6   : > { %588 = vst.msk [vmem:[#allocation4 + $0x60] sm:$0xff] %vm575_vm2, %v568_v32 }
 0x1e7   : > { %v570_v33 = vpop.xlane.xlu1 %569 }
 0x1e8   : > { %589 = vst.msk [vmem:[#allocation4 + $0x68] sm:$0xff] %vm575_vm2, %v570_v33 }
 0x1e9   : > { %v572_v50 = vpop.xlane.xlu0 %571 }
 0x1ea   : > { %590 = vst.msk [vmem:[#allocation4 + $0x70] sm:$0xff] %vm575_vm2, %v572_v50 }
 0x1eb   : > { %v574_v51 = vpop.xlane.xlu1 %573 }
 0x1ec   : > { %591 = vst.msk [vmem:[#allocation4 + $0x78] sm:$0xff] %vm575_vm2, %v574_v51 }
 0x1ed PF: > { %612 = vmax.xlane.f32.xlu1 %v1737_v40  ;;  %608 = vmax.xlane.f32.xlu0 %v1729_v36  ;;  %v1497_v52 = vmov 0   ;;  %v1807_v53 = vld [vmem:[#allocation2 + $0x10] sm:$0xff]  ;;  %v1809_v54 = vld [vmem:[#allocation2] sm:$0xff]  ;;  %vm912_vm3 = vcmask 7168   ;;  %v1817_v59 = vld [vmem:[#allocation2 + $0x18] sm:$0xff]  ;;  %p1191_p8 = scmp.ne.s32.totalorder %s1477_s9, 1 }
 0x1ee   : > { %1357 = vset.pattern.permute.xlu0 %v1497_v52  ;;  %1358 = vset.pattern.permute.xlu1 %v1497_v52  ;;  %v1819_v60 = vld [vmem:[#allocation2 + $0x8] sm:$0xff]  ;;  %v1838_v4 = vld [vmem:[#allocation2 + $0x20] sm:$0xff]  ;;  %v1855_v11 = vld [vmem:[#allocation2 + $0x38] sm:$0xff] }
 0x1ef   : > { %v1836_v3 = vld [vmem:[#allocation2 + $0x28] sm:$0xff]  ;;  %v1857_v12 = vld [vmem:[#allocation2 + $0x30] sm:$0xff]  ;;  %v1876_v20 = vld [vmem:[#allocation2 + $0x40] sm:$0xff] }
 0x1f0   : > { %v1874_v19 = vld [vmem:[#allocation2 + $0x48] sm:$0xff]  ;;  %v1893_v27 = vld [vmem:[#allocation2 + $0x58] sm:$0xff]  ;;  %v1895_v28 = vld [vmem:[#allocation2 + $0x50] sm:$0xff] }
 0x1f1   : > { %614 = vmax.xlane.f32.xlu1 %v1733_v38  ;;  %610 = vmax.xlane.f32.xlu0 %v1725_v34  ;;  %v1913_v51 = vld [vmem:[#allocation2 + $0x68] sm:$0xff]  ;;  %v1915_v52 = vld [vmem:[#allocation2 + $0x60] sm:$0xff] }
 0x1f5   : > { %618 = vmax.xlane.f32.xlu1 %v1741_v42  ;;  %616 = vmax.xlane.f32.xlu0 %v1745_v44 }
 0x1f9   : > { %622 = vmax.xlane.f32.xlu1 %v1749_v46  ;;  %620 = vmax.xlane.f32.xlu0 %v1753_v48 }
 0x1fd   : > { %626 = vmax.xlane.f32.xlu1 %v1727_v35  ;;  %624 = vmax.xlane.f32.xlu0 %v1731_v37 }
 0x201   : > { %630 = vmax.xlane.f32.xlu1 %v1735_v39  ;;  %628 = vmax.xlane.f32.xlu0 %v1739_v41 }
 0x205   : > { %634 = vmax.xlane.f32.xlu1 %v1743_v43  ;;  %632 = vmax.xlane.f32.xlu0 %v1747_v45 }
 0x209   : > { %638 = vmax.xlane.f32.xlu1 %v1751_v47  ;;  %636 = vmax.xlane.f32.xlu0 %v1755_v49 }
 0x276   : > { %v613_v55 = vpop.xlane.xlu1 %612  ;;  %v609_v56 = vpop.xlane.xlu0 %608 }
 0x277   : > { %v1812_v57 = vmax.f32 %v1807_v53, %v613_v55  ;;  %v1815_v58 = vmax.f32 %v1809_v54, %v609_v56 }
 0x279   : > { %v674_v61 = vsub.f32 %v1807_v53, %v1812_v57  ;;  %931 = vst.msk [vmem:[#allocation2 + $0x10] sm:$0xff] %vm912_vm3, %v1812_v57  ;;  %v672_v62 = vsub.f32 %v1809_v54, %v1815_v58  ;;  %929 = vst.msk [vmem:[#allocation2] sm:$0xff] %vm912_vm3, %v1815_v58  ;;  %738 = vperm.xlu0 %1357, %v1815_v58  }
 0x27a   : > { %v615_v63 = vpop.xlane.xlu1 %614  ;;  %v611_v0 = vpop.xlane.xlu0 %610 }
 0x27b   : > { %v1831_v1 = vmax.f32 %v1817_v59, %v615_v63  ;;  %v1834_v2 = vmax.f32 %v1819_v60, %v611_v0 }
 0x27d   : > { %932 = vst.msk [vmem:[#allocation2 + $0x18] sm:$0xff] %vm912_vm3, %v1831_v1  ;;  %v673_v6 = vsub.f32 %v1819_v60, %v1834_v2  ;;  %930 = vst.msk [vmem:[#allocation2 + $0x8] sm:$0xff] %vm912_vm3, %v1834_v2  ;;  %743 = vperm.xlu1 %1358, %v1834_v2  }
 0x27e   : > { %v619_v7 = vpop.xlane.xlu1 %618  ;;  %v617_v8 = vpop.xlane.xlu0 %616 }
 0x27f   : > { %v1850_v9 = vmax.f32 %v1836_v3, %v619_v7  ;;  %v1853_v10 = vmax.f32 %v1838_v4, %v617_v8 }
 0x281   : > { %934 = vst.msk [vmem:[#allocation2 + $0x28] sm:$0xff] %vm912_vm3, %v1850_v9  ;;  %748 = vperm.xlu1 %1358, %v1812_v57   ;;  %933 = vst.msk [vmem:[#allocation2 + $0x20] sm:$0xff] %vm912_vm3, %v1853_v10  ;;  %v2099_v54 = vsub.f32 %v1838_v4, %v1853_v10  ;;  %v2100_v60 = vsub.f32 %v1836_v3, %v1850_v9 }
 0x282   : > { %v623_v15 = vpop.xlane.xlu1 %622  ;;  %v621_v16 = vpop.xlane.xlu0 %620 }
 0x283   : > { %v1869_v17 = vmax.f32 %v1855_v11, %v623_v15  ;;  %v1872_v18 = vmax.f32 %v1857_v12, %v621_v16  ;;  %v1933_v15 = vld [vmem:[#allocation2 + $0x78] sm:$0xff]  ;;  %v1935_v16 = vld [vmem:[#allocation2 + $0x70] sm:$0xff]  ;;  %v696_v58 = vmul.f32 1.442695, %v2099_v54  ;;  %v698_v2 = vmul.f32 1.442695, %v2100_v60 }
 0x284   : > { %v664_v60 = vld [vmem:[#allocation3 + $0x40] sm:$0xff] }
 0x285   : > { %936 = vst.msk [vmem:[#allocation2 + $0x38] sm:$0xff] %vm912_vm3, %v1869_v17  ;;  %753 = vperm.xlu1 %1358, %v1831_v1   ;;  %935 = vst.msk [vmem:[#allocation2 + $0x30] sm:$0xff] %vm912_vm3, %v1872_v18  ;;  %v2102_v3 = vsub.f32 %v1855_v11, %v1869_v17 }
 0x286   : > { %v627_v23 = vpop.xlane.xlu1 %626  ;;  %v625_v24 = vpop.xlane.xlu0 %624 }
 0x287   : > { %v1888_v25 = vmax.f32 %v1874_v19, %v627_v23  ;;  %v1891_v26 = vmax.f32 %v1876_v20, %v625_v24 }
 0x289   : > { %938 = vst.msk [vmem:[#allocation2 + $0x48] sm:$0xff] %vm912_vm3, %v1888_v25  ;;  %758 = vperm.xlu1 %1358, %v1853_v10   ;;  %783 = vperm.xlu0 %1357, %v1888_v25   ;;  %937 = vst.msk [vmem:[#allocation2 + $0x40] sm:$0xff] %vm912_vm3, %v1891_v26 }
 0x28a   : > { %v631_v31 = vpop.xlane.xlu1 %630  ;;  %v629_v32 = vpop.xlane.xlu0 %628 }
 0x28b   : > { %v1908_v33 = vmax.f32 %v1893_v27, %v631_v31  ;;  %v1911_v50 = vmax.f32 %v1895_v28, %v629_v32 }
 0x28d   : > { %940 = vst.msk [vmem:[#allocation2 + $0x58] sm:$0xff] %vm912_vm3, %v1908_v33  ;;  %763 = vperm.xlu1 %1358, %v1850_v9   ;;  %793 = vperm.xlu0 %1357, %v1908_v33   ;;  %939 = vst.msk [vmem:[#allocation2 + $0x50] sm:$0xff] %vm912_vm3, %v1911_v50  ;;  %v702_v9 = vmul.f32 1.442695, %v2102_v3 }
 0x28e   : > { %v635_v63 = vpop.xlane.xlu1 %634  ;;  %v633_v0 = vpop.xlane.xlu0 %632 }
 0x28f   : > { %v1928_v7 = vmax.f32 %v1913_v51, %v635_v63  ;;  %v1931_v8 = vmax.f32 %v1915_v52, %v633_v0 }
 0x291   : > { %942 = vst.msk [vmem:[#allocation2 + $0x68] sm:$0xff] %vm912_vm3, %v1928_v7  ;;  %768 = vperm.xlu1 %1358, %v1872_v18   ;;  %803 = vperm.xlu0 %1357, %v1928_v7   ;;  %941 = vst.msk [vmem:[#allocation2 + $0x60] sm:$0xff] %vm912_vm3, %v1931_v8 }
 0x292   : > { %v639_v31 = vpop.xlane.xlu1 %638  ;;  %v637_v32 = vpop.xlane.xlu0 %636 }
 0x293   : > { %v1948_v63 = vmax.f32 %v1933_v15, %v639_v31  ;;  %v1951_v0 = vmax.f32 %v1935_v16, %v637_v32 }
 0x295   : > { %944 = vst.msk [vmem:[#allocation2 + $0x78] sm:$0xff] %vm912_vm3, %v1948_v63  ;;  %773 = vperm.xlu1 %1358, %v1869_v17   ;;  %813 = vperm.xlu0 %1357, %v1948_v63   ;;  %943 = vst.msk [vmem:[#allocation2 + $0x70] sm:$0xff] %vm912_vm3, %v1951_v0 }
 0x299   : > { %778 = vperm.xlu1 %1358, %v1891_v26  }
 0x29d   : > { %788 = vperm.xlu1 %1358, %v1911_v50  }
 0x2a1   : > { %798 = vperm.xlu1 %1358, %v1931_v8  }
 0x2a5   : > { %808 = vperm.xlu1 %1358, %v1951_v0  }
 0x2f4   : > { %v739_v31 = vpop.permute.xlu0 %738 }
 0x2f5   : > { %v816_v32 = vsub.f32 %v1729_v36, %v739_v31 }
 0x2f7   : > { %v832_v23 = vmul.f32 1.442695, %v816_v32 }
 0x2f8   : > { %v744_v56 = vpop.permute.xlu1 %743 }
 0x2f9   : > { %1359 = vpow2.f32 %v832_v23  ;;  %v817_v55 = vsub.f32 %v1725_v34, %v744_v56 }
 0x2fb   : > { %v834_v24 = vmul.f32 1.442695, %v817_v55 }
 0x2fc   : > { %v749_v30 = vpop.permute.xlu1 %748 }
 0x2fd   : > { %1361 = vpow2.f32 %v834_v24  ;;  %v818_v29 = vsub.f32 %v1737_v40, %v749_v30 }
 0x2ff   : > { %v836_v21 = vmul.f32 1.442695, %v818_v29 }
 0x300   : > { %v754_v22 = vpop.permute.xlu1 %753 }
 0x301   : > { %1363 = vpow2.f32 %v836_v21  ;;  %v819_v13 = vsub.f32 %v1733_v38, %v754_v22 }
 0x303   : > { %v838_v14 = vmul.f32 1.442695, %v819_v13 }
 0x304   : > { %v759_v5 = vpop.permute.xlu1 %758  ;;  %v784_v23 = vpop.permute.xlu0 %783 }
 0x305   : > { %1365 = vpow2.f32 %v838_v14  ;;  %v820_v36 = vsub.f32 %v1745_v44, %v759_v5  ;;  %v825_v44 = vsub.f32 %v1727_v35, %v784_v23 }
 0x306   : > { %v1360_v31 = vpop.eup %1359 }
 0x307   : > { %v840_v32 = vmul.f32 1.442695, %v820_v36  ;;  %864 = vadd.xlane.f32.xlu1 %v1360_v31  ;;  %v850_v36 = vmul.f32 1.442695, %v825_v44 }
 0x308   : > { %v764_v34 = vpop.permute.xlu1 %763  ;;  %v794_v21 = vpop.permute.xlu0 %793 }
 0x309   : > { %1367 = vpow2.f32 %v840_v32  ;;  %v821_v55 = vsub.f32 %v1741_v42, %v764_v34  ;;  %v827_v31 = vsub.f32 %v1735_v39, %v794_v21 }
 0x30a   : > { %v1362_v56 = vpop.eup %1361 }
 0x30b   : > { %v842_v40 = vmul.f32 1.442695, %v821_v55  ;;  %866 = vadd.xlane.f32.xlu0 %v1362_v56  ;;  %v854_v35 = vmul.f32 1.442695, %v827_v31 }
 0x30c   : > { %v769_v29 = vpop.permute.xlu1 %768  ;;  %v804_v24 = vpop.permute.xlu0 %803 }
 0x30d   : > { %1369 = vpow2.f32 %v842_v40  ;;  %v822_v38 = vsub.f32 %v1753_v48, %v769_v29  ;;  %v829_v23 = vsub.f32 %v1743_v43, %v804_v24 }
 0x30e   : > { %v1364_v13 = vpop.eup %1363 }
 0x30f   : > { %v844_v14 = vmul.f32 1.442695, %v822_v38  ;;  %868 = vadd.xlane.f32.xlu0 %v1364_v13  ;;  %v858_v39 = vmul.f32 1.442695, %v829_v23 }
 0x310   : > { %v774_v5 = vpop.permute.xlu1 %773 }
 0x311   : > { %1371 = vpow2.f32 %v844_v14  ;;  %v823_v22 = vsub.f32 %v1749_v46, %v774_v5  ;;  %v814_v46 = vpop.permute.xlu0 %813 }
 0x312   : > { %v1366_v30 = vpop.eup %1365  ;;  %v831_v21 = vsub.f32 %v1751_v47, %v814_v46 }
 0x313   : > { %v846_v42 = vmul.f32 1.442695, %v823_v22  ;;  %870 = vadd.xlane.f32.xlu1 %v1366_v30 }
 0x314   : > { %v779_v32 = vpop.permute.xlu1 %778  ;;  %v862_v43 = vmul.f32 1.442695, %v831_v21 }
 0x315   : > { %1373 = vpow2.f32 %v846_v42  ;;  %v824_v48 = vsub.f32 %v1731_v37, %v779_v32 }
 0x316   : > { %v1368_v34 = vpop.eup %1367  ;;  %1375 = vpow2.f32 %v850_v36 }
 0x317   : > { %v848_v55 = vmul.f32 1.442695, %v824_v48  ;;  %872 = vadd.xlane.f32.xlu0 %v1368_v34  ;;  %v690_v34 = vmul.f32 1.442695, %v673_v6  ;;  %v657_v6 = vld [vmem:[#allocation3 + $0x8] sm:$0xff] }
 0x318   : > { %v789_v56 = vpop.permute.xlu1 %788 }
 0x319   : > { %1377 = vpow2.f32 %v848_v55  ;;  %v826_v40 = vsub.f32 %v1739_v41, %v789_v56  ;;  %v692_v55 = vmul.f32 1.442695, %v674_v61  ;;  %v656_v56 = vld [vmem:[#allocation3] sm:$0xff] }
 0x31a   : > { %v1370_v29 = vpop.eup %1369  ;;  %1379 = vpow2.f32 %v854_v35  ;;  %v2098_v35 = vsub.f32 %v1817_v59, %v1831_v1  ;;  %v2101_v59 = vsub.f32 %v1857_v12, %v1872_v18  ;;  %v2103_v18 = vsub.f32 %v1874_v19, %v1888_v25 }
 0x31b   : > { %v852_v38 = vmul.f32 1.442695, %v826_v40  ;;  %874 = vadd.xlane.f32.xlu1 %v1370_v29  ;;  %v658_v29 = vld [vmem:[#allocation3 + $0x10] sm:$0xff]  ;;  %v2106_v19 = vsub.f32 %v1895_v28, %v1911_v50 }
 0x31c   : > { %v799_v37 = vpop.permute.xlu1 %798  ;;  %v694_v23 = vmul.f32 1.442695, %v2098_v35  ;;  %v700_v1 = vmul.f32 1.442695, %v2101_v59  ;;  %v666_v59 = vld [vmem:[#allocation3 + $0x50] sm:$0xff] }
 0x31d   : > { %1381 = vpow2.f32 %v852_v38  ;;  %v828_v13 = vsub.f32 %v1747_v45, %v799_v37  ;;  %v708_v25 = vmul.f32 1.442695, %v2106_v19 }
 0x31e   : > { %v1372_v14 = vpop.eup %1371  ;;  %1383 = vpow2.f32 %v858_v39 }
 0x31f   : > { %v856_v44 = vmul.f32 1.442695, %v828_v13  ;;  %876 = vadd.xlane.f32.xlu0 %v1372_v14  ;;  %v659_v13 = vld [vmem:[#allocation3 + $0x18] sm:$0xff]  ;;  %v706_v14 = vmul.f32 1.442695, %v2103_v18 }
 0x320   : > { %v809_v5 = vpop.permute.xlu1 %808 }
 0x321   : > { %1385 = vpow2.f32 %v856_v44  ;;  %v830_v41 = vsub.f32 %v1755_v49, %v809_v5  ;;  %v688_v49 = vmul.f32 1.442695, %v672_v62  ;;  %v2104_v44 = vsub.f32 %v1876_v20, %v1891_v26 }
 0x322   : > { %v1374_v22 = vpop.eup %1373  ;;  %1387 = vpow2.f32 %v862_v43 }
 0x323   : > { %v860_v30 = vmul.f32 1.442695, %v830_v41  ;;  %878 = vadd.xlane.f32.xlu1 %v1374_v22  ;;  %v1376_v24 = vpop.eup %1375  ;;  %v704_v43 = vmul.f32 1.442695, %v2104_v44  ;;  %v660_v41 = vld [vmem:[#allocation3 + $0x20] sm:$0xff] }
 0x325   : > { %1389 = vpow2.f32 %v860_v30  ;;  %v2105_v30 = vsub.f32 %v1893_v27, %v1908_v33  ;;  %v2108_v27 = vsub.f32 %v1915_v52, %v1931_v8 }
 0x326   : > { %v1378_v47 = vpop.eup %1377  ;;  %1391 = vpow2.f32 %v688_v49 }
 0x327   : > { %880 = vadd.xlane.f32.xlu0 %v1378_v47  ;;  %882 = vadd.xlane.f32.xlu1 %v1376_v24  ;;  %v1380_v42 = vpop.eup %1379  ;;  %1393 = vpow2.f32 %v690_v34  ;;  %v710_v24 = vmul.f32 1.442695, %v2105_v30  ;;  %v712_v33 = vmul.f32 1.442695, %v2108_v27  ;;  %v2109_v34 = vsub.f32 %v1933_v15, %v1948_v63 }
 0x328   : > { %1395 = vpow2.f32 %v692_v55 }
 0x329   : > { %1397 = vpow2.f32 %v694_v23  ;;  %v718_v55 = vmul.f32 1.442695, %v2109_v34  ;;  %v663_v23 = vld [vmem:[#allocation3 + $0x38] sm:$0xff] }
 0x32a   : > { %v1382_v45 = vpop.eup %1381  ;;  %1399 = vpow2.f32 %v696_v58 }
 0x32b   : > { %884 = vadd.xlane.f32.xlu0 %v1382_v45  ;;  %886 = vadd.xlane.f32.xlu1 %v1380_v42  ;;  %v1384_v36 = vpop.eup %1383  ;;  %1401 = vpow2.f32 %v698_v2  ;;  %v661_v42 = vld [vmem:[#allocation3 + $0x28] sm:$0xff] }
 0x32c   : > { %1403 = vpow2.f32 %v700_v1 }
 0x32d   : > { %1405 = vpow2.f32 %v702_v9 }
 0x32e   : > { %v1386_v31 = vpop.eup %1385  ;;  %1407 = vpow2.f32 %v706_v14 }
 0x32f   : > { %888 = vadd.xlane.f32.xlu0 %v1386_v31  ;;  %890 = vadd.xlane.f32.xlu1 %v1384_v36  ;;  %v1388_v32 = vpop.eup %1387  ;;  %1409 = vpow2.f32 %v704_v43  ;;  %v2107_v36 = vsub.f32 %v1913_v51, %v1928_v7  ;;  %v2110_v51 = vsub.f32 %v1935_v16, %v1951_v0 }
 0x330   : > { %1411 = vpow2.f32 %v710_v24 }
 0x331   : > { %v714_v31 = vmul.f32 1.442695, %v2107_v36  ;;  %1413 = vpow2.f32 %v708_v25  ;;  %v716_v7 = vmul.f32 1.442695, %v2110_v51 }
 0x332   : > { %v1390_v48 = vpop.eup %1389 }
 0x333   : > { %892 = vadd.xlane.f32.xlu0 %v1390_v48  ;;  %894 = vadd.xlane.f32.xlu1 %v1388_v32  ;;  %v1392_v62 = vpop.eup %1391  ;;  %v662_v48 = vld [vmem:[#allocation3 + $0x30] sm:$0xff]  ;;  %1415 = vpow2.f32 %v714_v31 }
 0x334   : > { %v720_v53 = vmul.f32 %v1392_v62, %v656_v56  ;;  %v1394_v57 = vpop.eup %1393  ;;  %1417 = vpow2.f32 %v712_v33  ;;  %v665_v56 = vld [vmem:[#allocation3 + $0x48] sm:$0xff] }
 0x335   : > { %v721_v4 = vmul.f32 %v1394_v57, %v657_v6  ;;  %v1396_v10 = vpop.eup %1395  ;;  %1419 = vpow2.f32 %v718_v55 }
 0x336   : > { %v722_v39 = vmul.f32 %v1396_v10, %v658_v29  ;;  %v1398_v21 = vpop.eup %1397  ;;  %1421 = vpow2.f32 %v716_v7 }
 0x337   : > { %v723_v11 = vmul.f32 %v1398_v21, %v659_v13  ;;  %v1400_v17 = vpop.eup %1399  ;;  %v668_v21 = vld [vmem:[#allocation3 + $0x60] sm:$0xff] }
 0x338   : > { %v724_v20 = vmul.f32 %v1400_v17, %v660_v41  ;;  %v1402_v26 = vpop.eup %1401  ;;  %v671_v17 = vld [vmem:[#allocation3 + $0x78] sm:$0xff] }
 0x339   : > { %v725_v28 = vmul.f32 %v1402_v26, %v661_v42  ;;  %v1404_v50 = vpop.eup %1403 }
 0x33a   : > { %v726_v52 = vmul.f32 %v1404_v50, %v662_v48  ;;  %v1406_v8 = vpop.eup %1405 }
 0x33b   : > { %v1408_v58 = vpop.eup %1407  ;;  %v727_v62 = vmul.f32 %v1406_v8, %v663_v23 }
 0x33c   : > { %v1410_v15 = vpop.eup %1409  ;;  %v729_v0 = vmul.f32 %v1408_v58, %v665_v56 }
 0x33d   : > { %v1412_v16 = vpop.eup %1411 }
 0x33e   : > { %v1414_v57 = vpop.eup %1413 }
 0x33f   : > { %v730_v29 = vmul.f32 %v1414_v57, %v666_v59 }
 0x340   : > { %v1416_v10 = vpop.eup %1415 }
 0x390   : > { %v865_v61 = vpop.xlane.xlu1 %864 }
 0x391   : > { %v896_v46 = vadd.f32 %v865_v61, %v720_v53  ;;  %v728_v53 = vmul.f32 %v1410_v15, %v664_v60 }
 0x393   : > { %913 = vst.msk [vmem:[#allocation3] sm:$0xff] %vm912_vm3, %v896_v46  ;;  %v667_v46 = vld [vmem:[#allocation3 + $0x58] sm:$0xff] }
 0x394   : > { %v867_v40 = vpop.xlane.xlu0 %866 }
 0x395   : > { %v897_v38 = vadd.f32 %v867_v40, %v721_v4  ;;  %v731_v40 = vmul.f32 %v1412_v16, %v667_v46 }
 0x397   : > { %914 = vst.msk [vmem:[#allocation3 + $0x8] sm:$0xff] %vm912_vm3, %v897_v38  ;;  %v1418_v38 = vpop.eup %1417 }
 0x398   : > { %v869_v37 = vpop.xlane.xlu0 %868  ;;  %v732_v14 = vmul.f32 %v1418_v38, %v668_v21 }
 0x399   : > { %v898_v12 = vadd.f32 %v869_v37, %v722_v39  ;;  %v669_v39 = vld [vmem:[#allocation3 + $0x68] sm:$0xff] }
 0x39a   : > { %v733_v18 = vmul.f32 %v1416_v10, %v669_v39 }
 0x39b   : > { %915 = vst.msk [vmem:[#allocation3 + $0x10] sm:$0xff] %vm912_vm3, %v898_v12  ;;  %v1420_v12 = vpop.eup %1419 }
 0x39c   : > { %v871_v5 = vpop.xlane.xlu1 %870  ;;  %v1422_v44 = vpop.eup %1421  ;;  %v735_v30 = vmul.f32 %v1420_v12, %v671_v17 }
 0x39d   : > { %v899_v22 = vadd.f32 %v871_v5, %v723_v11  ;;  %v670_v5 = vld [vmem:[#allocation3 + $0x70] sm:$0xff] }
 0x39e   : > { %v734_v24 = vmul.f32 %v1422_v44, %v670_v5 }
 0x39f   : > { %916 = vst.msk [vmem:[#allocation3 + $0x18] sm:$0xff] %vm912_vm3, %v899_v22 }
 0x3a0   : > { %v873_v47 = vpop.xlane.xlu0 %872 }
 0x3a1   : > { %v900_v45 = vadd.f32 %v873_v47, %v724_v20 }
 0x3a3   : > { %917 = vst.msk [vmem:[#allocation3 + $0x20] sm:$0xff] %vm912_vm3, %v900_v45 }
 0x3a4   : > { %v875_v32 = vpop.xlane.xlu1 %874 }
 0x3a5   : > { %v901_v49 = vadd.f32 %v875_v32, %v725_v28 }
 0x3a7   : > { %918 = vst.msk [vmem:[#allocation3 + $0x28] sm:$0xff] %vm912_vm3, %v901_v49 }
 0x3a8   : > { %v877_v35 = vpop.xlane.xlu0 %876 }
 0x3a9   : > { %v902_v54 = vadd.f32 %v877_v35, %v726_v52 }
 0x3ab   : > { %919 = vst.msk [vmem:[#allocation3 + $0x30] sm:$0xff] %vm912_vm3, %v902_v54 }
 0x3ac   : > { %v879_v63 = vpop.xlane.xlu1 %878 }
 0x3ad   : > { %v903_v2 = vadd.f32 %v879_v63, %v727_v62 }
 0x3af   : > { %920 = vst.msk [vmem:[#allocation3 + $0x38] sm:$0xff] %vm912_vm3, %v903_v2 }
 0x3b0   : > { %v883_v61 = vpop.xlane.xlu1 %882  ;;  %v881_v6 = vpop.xlane.xlu0 %880 }
 0x3b1   : > { %v905_v1 = vadd.f32 %v883_v61, %v729_v0  ;;  %v904_v4 = vadd.f32 %v881_v6, %v728_v53 }
 0x3b3   : > { %922 = vst.msk [vmem:[#allocation3 + $0x48] sm:$0xff] %vm912_vm3, %v905_v1  ;;  %921 = vst.msk [vmem:[#allocation3 + $0x40] sm:$0xff] %vm912_vm3, %v904_v4 }
 0x3b4   : > { %v887_v3 = vpop.xlane.xlu1 %886  ;;  %v885_v9 = vpop.xlane.xlu0 %884 }
 0x3b5   : > { %v907_v37 = vadd.f32 %v887_v3, %v731_v40  ;;  %v906_v13 = vadd.f32 %v885_v9, %v730_v29 }
 0x3b7   : > { %924 = vst.msk [vmem:[#allocation3 + $0x58] sm:$0xff] %vm912_vm3, %v907_v37  ;;  %923 = vst.msk [vmem:[#allocation3 + $0x50] sm:$0xff] %vm912_vm3, %v906_v13 }
 0x3b8   : > { %v891_v43 = vpop.xlane.xlu1 %890  ;;  %v889_v11 = vpop.xlane.xlu0 %888 }
 0x3b9   : > { %v909_v41 = vadd.f32 %v891_v43, %v733_v18  ;;  %v908_v22 = vadd.f32 %v889_v11, %v732_v14 }
 0x3bb   : > { %926 = vst.msk [vmem:[#allocation3 + $0x68] sm:$0xff] %vm912_vm3, %v909_v41  ;;  %925 = vst.msk [vmem:[#allocation3 + $0x60] sm:$0xff] %vm912_vm3, %v908_v22  ;;  %948 = sbr.rel (%p1191_p8) target bundleno = 997 (0x3e5), region = 40 }
 0x3bc   : > { %v895_v19 = vpop.xlane.xlu1 %894  ;;  %v893_v25 = vpop.xlane.xlu0 %892 }
 0x3bd   : > { %v911_v20 = vadd.f32 %v895_v19, %v735_v30  ;;  %v910_v26 = vadd.f32 %v893_v25, %v734_v24 }
 0x3bf   : > { %928 = vst.msk [vmem:[#allocation3 + $0x78] sm:$0xff] %vm912_vm3, %v911_v20  ;;  %927 = vst.msk [vmem:[#allocation3 + $0x70] sm:$0xff] %vm912_vm3, %v910_v26 }
 0x3c0   : > { %v981_v47 = vld [vmem:[#allocation3] sm:$0xff]  ;;  %v982_v42 = vld [vmem:[#allocation3 + $0x8] sm:$0xff]  ;;  %v983_v45 = vld [vmem:[#allocation3 + $0x10] sm:$0xff] }
 0x3c1   : > { %1423 = vlog2.f32 %v981_v47  ;;  %v984_v36 = vld [vmem:[#allocation3 + $0x18] sm:$0xff]  ;;  %v985_v31 = vld [vmem:[#allocation3 + $0x20] sm:$0xff]  ;;  %v986_v27 = vld [vmem:[#allocation3 + $0x28] sm:$0xff] }
 0x3c2   : > { %1425 = vlog2.f32 %v982_v42  ;;  %v987_v33 = vld [vmem:[#allocation3 + $0x30] sm:$0xff]  ;;  %v988_v28 = vld [vmem:[#allocation3 + $0x38] sm:$0xff]  ;;  %v989_v50 = vld [vmem:[#allocation3 + $0x40] sm:$0xff] }
 0x3c3   : > { %1427 = vlog2.f32 %v983_v45  ;;  %v990_v32 = vld [vmem:[#allocation3 + $0x48] sm:$0xff]  ;;  %v991_v48 = vld [vmem:[#allocation3 + $0x50] sm:$0xff]  ;;  %v992_v49 = vld [vmem:[#allocation3 + $0x58] sm:$0xff] }
 0x3c4   : > { %1429 = vlog2.f32 %v984_v36  ;;  %v993_v34 = vld [vmem:[#allocation3 + $0x60] sm:$0xff]  ;;  %v994_v55 = vld [vmem:[#allocation3 + $0x68] sm:$0xff]  ;;  %v967_v63 = vld [vmem:[#allocation2 + $0x10] sm:$0xff] }
 0x3c5   : > { %1431 = vlog2.f32 %v985_v31  ;;  %v965_v7 = vld [vmem:[#allocation2] sm:$0xff]  ;;  %v966_v23 = vld [vmem:[#allocation2 + $0x8] sm:$0xff]  ;;  %v968_v0 = vld [vmem:[#allocation2 + $0x18] sm:$0xff] }
 0x3c6   : > { %1433 = vlog2.f32 %v986_v27  ;;  %v995_v52 = vld [vmem:[#allocation3 + $0x70] sm:$0xff]  ;;  %v996_v54 = vld [vmem:[#allocation3 + $0x78] sm:$0xff]  ;;  %v949_v62 = vld [vmem:[#allocation4] sm:$0xff] }
 0x3c7   : > { %1435 = vlog2.f32 %v987_v33  ;;  %v950_v2 = vld [vmem:[#allocation4 + $0x8] sm:$0xff]  ;;  %v951_v61 = vld [vmem:[#allocation4 + $0x10] sm:$0xff]  ;;  %v969_v46 = vld [vmem:[#allocation2 + $0x20] sm:$0xff] }
 0x3c8   : > { %1437 = vlog2.f32 %v988_v28  ;;  %v952_v10 = vld [vmem:[#allocation4 + $0x18] sm:$0xff]  ;;  %v970_v29 = vld [vmem:[#allocation2 + $0x28] sm:$0xff]  ;;  %v953_v39 = vld [vmem:[#allocation4 + $0x20] sm:$0xff] }
 0x3c9   : > { %1439 = vlog2.f32 %v989_v50  ;;  %v971_v37 = vld [vmem:[#allocation2 + $0x30] sm:$0xff]  ;;  %v954_v14 = vld [vmem:[#allocation4 + $0x28] sm:$0xff]  ;;  %v972_v43 = vld [vmem:[#allocation2 + $0x38] sm:$0xff] }
 0x3ca   : > { %1441 = vlog2.f32 %v990_v32  ;;  %v955_v41 = vld [vmem:[#allocation4 + $0x30] sm:$0xff]  ;;  %v973_v30 = vld [vmem:[#allocation2 + $0x40] sm:$0xff]  ;;  %v956_v20 = vld [vmem:[#allocation4 + $0x38] sm:$0xff] }
 0x3cb   : > { %1443 = vlog2.f32 %v991_v48  ;;  %v974_v47 = vld [vmem:[#allocation2 + $0x48] sm:$0xff]  ;;  %v957_v31 = vld [vmem:[#allocation4 + $0x40] sm:$0xff]  ;;  %v975_v33 = vld [vmem:[#allocation2 + $0x50] sm:$0xff] }
 0x3cc   : > { %1445 = vlog2.f32 %v992_v49  ;;  %v958_v48 = vld [vmem:[#allocation4 + $0x48] sm:$0xff] }
 0x3cd   : > { %1447 = vlog2.f32 %v993_v34  ;;  %v976_v34 = vld [vmem:[#allocation2 + $0x58] sm:$0xff] }
 0x3ce   : > { %v1424_v51 = vpop.eup %1423  ;;  %1449 = vlog2.f32 %v994_v55 }
 0x3cf   : > { %v1426_v8 = vpop.eup %1425  ;;  %v998_v35 = vmul.f32 0.6931472, %v1424_v51  ;;  %1451 = vlog2.f32 %v995_v52  ;;  %v959_v52 = vld [vmem:[#allocation4 + $0x50] sm:$0xff] }
 0x3d0   : > { %v1428_v58 = vpop.eup %1427  ;;  %v1000_v15 = vmul.f32 0.6931472, %v1426_v8  ;;  %1453 = vlog2.f32 %v996_v54 }
 0x3d1   : > { %v1430_v56 = vpop.eup %1429  ;;  %v1029_v60 = vadd.f32 %v998_v35, %v965_v7  ;;  %v1002_v16 = vmul.f32 0.6931472, %v1428_v58  ;;  %v977_v35 = vld [vmem:[#allocation2 + $0x60] sm:$0xff] }
 0x3d2   : > { %v1432_v53 = vpop.eup %1431  ;;  %v1030_v57 = vadd.f32 %v1000_v15, %v966_v23  ;;  %v1004_v6 = vmul.f32 0.6931472, %v1430_v56 }
 0x3d3   : > { %v1434_v59 = vpop.eup %1433  ;;  %v1045_v1 = vsub.f32 %v949_v62, %v1029_v60  ;;  %v1031_v4 = vadd.f32 %v1002_v16, %v967_v63  ;;  %v1006_v40 = vmul.f32 0.6931472, %v1432_v53  ;;  %v960_v62 = vld [vmem:[#allocation4 + $0x58] sm:$0xff]  ;;  %v978_v63 = vld [vmem:[#allocation2 + $0x68] sm:$0xff]  ;;  %v961_v16 = vld [vmem:[#allocation4 + $0x60] sm:$0xff] }
 0x3d4   : > { %v1436_v38 = vpop.eup %1435  ;;  %v1046_v3 = vsub.f32 %v950_v2, %v1030_v57  ;;  %v1032_v9 = vadd.f32 %v1004_v6, %v968_v0  ;;  %v1008_v21 = vmul.f32 0.6931472, %v1434_v59  ;;  %v979_v53 = vld [vmem:[#allocation2 + $0x70] sm:$0xff] }
 0x3d5   : > { %v1438_v13 = vpop.eup %1437  ;;  %1061 = vst.msk [vmem:[%s1556_s23] sm:$0xff] %vm912_vm3, %v1045_v1  ;;  %v1047_v12 = vsub.f32 %v951_v61, %v1031_v4  ;;  %v1033_v18 = vadd.f32 %v1006_v40, %v969_v46  ;;  %v1010_v44 = vmul.f32 0.6931472, %v1436_v38  ;;  %v962_v46 = vld [vmem:[#allocation4 + $0x68] sm:$0xff]  ;;  %v980_v1 = vld [vmem:[#allocation2 + $0x78] sm:$0xff]  ;;  %v963_v40 = vld [vmem:[#allocation4 + $0x70] sm:$0xff] }
 0x3d6   : > { %v1440_v11 = vpop.eup %1439  ;;  %1062 = vst.msk [vmem:[%s1556_s23 + $0x8] sm:$0xff] %vm912_vm3, %v1046_v3  ;;  %v1048_v17 = vsub.f32 %v952_v10, %v1032_v9  ;;  %v1034_v5 = vadd.f32 %v1008_v21, %v970_v29  ;;  %v1012_v22 = vmul.f32 0.6931472, %v1438_v13  ;;  %v964_v9 = vld [vmem:[#allocation4 + $0x78] sm:$0xff] }
 0x3d7   : > { %v1442_v24 = vpop.eup %1441  ;;  %1063 = vst.msk [vmem:[%s1556_s23 + $0x10] sm:$0xff] %vm912_vm3, %v1047_v12  ;;  %v1049_v19 = vsub.f32 %v953_v39, %v1033_v18  ;;  %v1035_v25 = vadd.f32 %v1010_v44, %v971_v37  ;;  %v1014_v26 = vmul.f32 0.6931472, %v1440_v11 }
 0x3d8   : > { %v1444_v42 = vpop.eup %1443  ;;  %1064 = vst.msk [vmem:[%s1556_s23 + $0x18] sm:$0xff] %vm912_vm3, %v1048_v17  ;;  %v1050_v45 = vsub.f32 %v954_v14, %v1034_v5  ;;  %v1036_v36 = vadd.f32 %v1012_v22, %v972_v43  ;;  %v1016_v27 = vmul.f32 0.6931472, %v1442_v24 }
 0x3d9   : > { %v1446_v28 = vpop.eup %1445  ;;  %1065 = vst.msk [vmem:[%s1556_s23 + $0x20] sm:$0xff] %vm912_vm3, %v1049_v19  ;;  %v1051_v50 = vsub.f32 %v955_v41, %v1035_v25  ;;  %v1037_v32 = vadd.f32 %v1014_v26, %v973_v30  ;;  %v1018_v49 = vmul.f32 0.6931472, %v1444_v42 }
 0x3da   : > { %v1448_v55 = vpop.eup %1447  ;;  %1066 = vst.msk [vmem:[%s1556_s23 + $0x28] sm:$0xff] %vm912_vm3, %v1050_v45  ;;  %v1052_v51 = vsub.f32 %v956_v20, %v1036_v36  ;;  %v1038_v7 = vadd.f32 %v1016_v27, %v974_v47  ;;  %v1020_v8 = vmul.f32 0.6931472, %v1446_v28 }
 0x3db   : > { %v1450_v23 = vpop.eup %1449  ;;  %1067 = vst.msk [vmem:[%s1556_s23 + $0x30] sm:$0xff] %vm912_vm3, %v1051_v50  ;;  %v1053_v54 = vsub.f32 %v957_v31, %v1037_v32  ;;  %v1039_v58 = vadd.f32 %v1018_v49, %v975_v33  ;;  %v1022_v15 = vmul.f32 0.6931472, %v1448_v55 }
 0x3dc   : > { %v1452_v56 = vpop.eup %1451  ;;  %1068 = vst.msk [vmem:[%s1556_s23 + $0x38] sm:$0xff] %vm912_vm3, %v1052_v51  ;;  %v1054_v60 = vsub.f32 %v958_v48, %v1038_v7  ;;  %v1040_v2 = vadd.f32 %v1020_v8, %v976_v34  ;;  %v1024_v0 = vmul.f32 0.6931472, %v1450_v23 }
 0x3dd   : > { %v1454_v57 = vpop.eup %1453  ;;  %1069 = vst.msk [vmem:[%s1556_s23 + $0x40] sm:$0xff] %vm912_vm3, %v1053_v54  ;;  %v1055_v61 = vsub.f32 %v959_v52, %v1039_v58  ;;  %v1041_v6 = vadd.f32 %v1022_v15, %v977_v35  ;;  %v1026_v59 = vmul.f32 0.6931472, %v1452_v56 }
 0x3de   : > { %1070 = vst.msk [vmem:[%s1556_s23 + $0x48] sm:$0xff] %vm912_vm3, %v1054_v60  ;;  %v1056_v4 = vsub.f32 %v960_v62, %v1040_v2  ;;  %v1042_v10 = vadd.f32 %v1024_v0, %v978_v63  ;;  %v1028_v29 = vmul.f32 0.6931472, %v1454_v57 }
 0x3df   : > { %1071 = vst.msk [vmem:[%s1556_s23 + $0x50] sm:$0xff] %vm912_vm3, %v1055_v61  ;;  %v1057_v38 = vsub.f32 %v961_v16, %v1041_v6  ;;  %v1043_v3 = vadd.f32 %v1026_v59, %v979_v53 }
 0x3e0   : > { %1072 = vst.msk [vmem:[%s1556_s23 + $0x58] sm:$0xff] %vm912_vm3, %v1056_v4  ;;  %v1058_v39 = vsub.f32 %v962_v46, %v1042_v10  ;;  %v1044_v21 = vadd.f32 %v1028_v29, %v980_v1 }
 0x3e1   : > { %1073 = vst.msk [vmem:[%s1556_s23 + $0x60] sm:$0xff] %vm912_vm3, %v1057_v38  ;;  %v1059_v37 = vsub.f32 %v963_v40, %v1043_v3 }
 0x3e2   : > { %1074 = vst.msk [vmem:[%s1556_s23 + $0x68] sm:$0xff] %vm912_vm3, %v1058_v39  ;;  %v1060_v13 = vsub.f32 %v964_v9, %v1044_v21 }
 0x3e3   : > { %1075 = vst.msk [vmem:[%s1556_s23 + $0x70] sm:$0xff] %vm912_vm3, %v1059_v37 }
 0x3e4   : > { %1076 = vst.msk [vmem:[%s1556_s23 + $0x78] sm:$0xff] %vm912_vm3, %v1060_v13 }
 0x3e5 PF: > { %s12_s13 = sadd.s32 1, %s1493_s13   ;;  %s2111_s9 = smov %s1485_s11 }
 0x3e6   : > { %p9_p9 = scmp.ge.s32.totalorder %s12_s13, 6   ;;  %s2112_s10 = smov %s1489_s12 }
 0x3e7   : > { %s2113_s11 = smov %s2116_s14  ;;  %s2114_s12 = smov %s2120_s15 }
 0x3e8   :  { %11 = sbr.rel (!%p9_p9) target bundleno = 3 (0x3), region = 71 }

</bundles_post_ra>
